<compile_context>
chip_gen: v6e
topology: v6e:2x2x1
jax: 0.10.0
libtpu: 0.0.40
codegen_flags: <defaults>
</compile_context>

<pallas_src>
import numpy as np
import jax
import jax.numpy as jnp
from jax.experimental import pallas as pl
from jax.experimental.pallas import tpu as pltpu


# ----------------------------------------------------------------------------
# Fused kernel: low conv (+BN+ReLU, width-upsampled) -> high conv (+BN+ReLU)
#               -> height-upsample + add, all in one grid step per batch element.
# ----------------------------------------------------------------------------
def _last_octave_kernel(xh_ref, xl_ref, wbh_ref, wbl_ref, bh_ref, bl_ref,
                        o_ref, xhp_ref, xlp_ref):
    # xh_ref : (1, H,  W*Ch)         lane-packed high-freq input rows
    # xl_ref : (1, Hl, Wl*Cl)        lane-packed low-freq input rows (Hl=H/2, Wl=W/2)
    # wbh_ref: (3, W*Ch,  W*Cout)    banded conv weights (BN scale folded), high branch
    # wbl_ref: (3, Wl*Cl, W*Cout)    banded conv weights (BN scale + width 2x upsample folded)
    # b*_ref : (1, W*Cout)           folded BN bias, tiled across width
    # o_ref  : (1, H, W*Cout)        lane-dense output (W*Cout = 128 here)
    # x*p_ref: VMEM scratch with a 1-row zero halo top and bottom (height padding)
    H, WCo = o_ref.shape[1], o_ref.shape[2]
    Hl = xl_ref.shape[1]
    WCh = xh_ref.shape[2]
    WCl = xl_ref.shape[2]

    # In-kernel height halo (width halo is folded into the banded weights).
    zh = jnp.zeros((1, WCh), xhp_ref.dtype)
    zl = jnp.zeros((1, WCl), xlp_ref.dtype)
    xhp_ref[0:1, :] = zh
    xhp_ref[H + 1:H + 2, :] = zh
    xlp_ref[0:1, :] = zl
    xlp_ref[Hl + 1:Hl + 2, :] = zl
    xhp_ref[1:H + 1, :] = xh_ref[0]
    xlp_ref[1:Hl + 1, :] = xl_ref[0]

    # ---- Low-frequency branch: 3 banded matmuls (one per vertical tap).
    #      Width padding, 2x width upsample and BN scale are folded into wbl,
    #      so the result is already width-upsampled, lane-packed (Hl, W*Cout). ----
    yl = jnp.dot(xlp_ref[0:Hl, :], wbl_ref[0], preferred_element_type=jnp.float32)
    yl = yl + jnp.dot(xlp_ref[1:Hl + 1, :], wbl_ref[1], preferred_element_type=jnp.float32)
    yl = yl + jnp.dot(xlp_ref[2:Hl + 2, :], wbl_ref[2], preferred_element_type=jnp.float32)
    yl = jnp.maximum(yl + bl_ref[...], 0.0)                            # (Hl, W*Cout)

    # ---- High-frequency branch. ----
    yh = jnp.dot(xhp_ref[0:H, :], wbh_ref[0], preferred_element_type=jnp.float32)
    yh = yh + jnp.dot(xhp_ref[1:H + 1, :], wbh_ref[1], preferred_element_type=jnp.float32)
    yh = yh + jnp.dot(xhp_ref[2:H + 2, :], wbh_ref[2], preferred_element_type=jnp.float32)
    yh = jnp.maximum(yh + bh_ref[...], 0.0)                            # (H, W*Cout)

    # ---- Nearest 2x height upsample of the low branch + fused residual add,
    #      stored as a single lane-dense block. ----
    yl_up = jnp.broadcast_to(yl[:, None, :], (Hl, 2, WCo)).reshape(2 * Hl, WCo)
    o_ref[0] = (yh + yl_up).astype(o_ref.dtype)


# ----------------------------------------------------------------------------
# Wrapper-side weight preparation (pure glue, traced once under jit).
# ----------------------------------------------------------------------------
def _banded_weights(w_oihw, w_in, w_out, up):
    """Per-vertical-tap banded matrices computing a 3-tap width conv with zero padding
    -- and, when up=2, the nearest-2x width upsample of its output -- as matmuls
    on lane-packed rows.

    band[ky][wi*Cin + ci, wo*Cout + co] = w[co, ci, ky, kx] with kx = wi - wo//up + 1
    (zero if kx out of range), matching concat order of lane-packed activations.
    """
    Cout, Cin = w_oihw.shape[0], w_oihw.shape[1]
    w = jnp.transpose(w_oihw, (2, 3, 1, 0)).astype(jnp.float32)      # (ky, kx, Cin, Cout)
    # Static 0/1 selector: input width wi feeds output width wo through tap kx.
    sel = np.zeros((3, w_in, w_out), np.float32)
    for kx in range(3):
        for wo in range(w_out):
            wi = wo // up + kx - 1
            if 0 <= wi < w_in:
                sel[kx, wi, wo] = 1.0
    wb = jnp.einsum("xiw,yxcd->yicwd", jnp.asarray(sel), w)          # (ky, w_in, Cin, w_out, Cout)
    return wb.reshape(3, w_in * Cin, w_out * Cout)


@jax.jit
def last_octave_conv(x_h_nchw, x_l_nchw, params, eps=1e-5):
    """LastOctaveConv forward (stride=1, inference BN). NCHW in/out at the boundary;
    everything in between is lane-packed NHWC rows."""
    N, Ch, H, W = x_h_nchw.shape
    _, Cl, Hl, Wl = x_l_nchw.shape
    Cout = params["w_h2h"].shape[0]

    # NCHW -> NHWC -> lane-packed rows (N, H, W*C).  (Single boundary transpose;
    # in a full network, keep activations in this layout across layers.)
    xh = jnp.transpose(x_h_nchw, (0, 2, 3, 1)).reshape(N, H, W * Ch)
    xl = jnp.transpose(x_l_nchw, (0, 2, 3, 1)).reshape(N, Hl, Wl * Cl)

    def fold_bn(g, b, m, v):
        s = (g / jnp.sqrt(v + eps)).astype(jnp.float32)
        return s, (b - m * s).astype(jnp.float32)

    sh, bh = fold_bn(params["g_h2h"], params["b_h2h"], params["m_h2h"], params["v_h2h"])
    sl, bl = fold_bn(params["g_l2h"], params["b_l2h"], params["m_l2h"], params["v_l2h"])

    # Fold BN scale into the conv weights (per output channel); keep bias separate.
    w_h = params["w_h2h"] * sh[:, None, None, None]
    w_l = params["w_l2h"] * sl[:, None, None, None]
    wbh = _banded_weights(w_h, W, W, up=1)
    wbl = _banded_weights(w_l, Wl, W, up=2)

    # Tile per-channel bias across the lane-packed width axis -> (1, W*Cout).
    bh2 = jnp.tile(bh, W).reshape(1, W * Cout)
    bl2 = jnp.tile(bl, W).reshape(1, W * Cout)

    out_rows = pl.pallas_call(
        _last_octave_kernel,
        out_shape=jax.ShapeDtypeStruct((N, H, W * Cout), jnp.float32),
        grid=(N,),
        in_specs=[
            pl.BlockSpec((1, H, W * Ch), lambda n: (n, 0, 0)),
            pl.BlockSpec((1, Hl, Wl * Cl), lambda n: (n, 0, 0)),
            pl.BlockSpec((3, W * Ch, W * Cout), lambda n: (0, 0, 0)),
            pl.BlockSpec((3, Wl * Cl, W * Cout), lambda n: (0, 0, 0)),
            pl.BlockSpec((1, W * Cout), lambda n: (0, 0)),
            pl.BlockSpec((1, W * Cout), lambda n: (0, 0)),
        ],
        out_specs=pl.BlockSpec((1, H, W * Cout), lambda n: (n, 0, 0)),
        scratch_shapes=[
            pltpu.VMEM((H + 2, W * Ch), jnp.float32),     # high-branch height halo
            pltpu.VMEM((Hl + 2, Wl * Cl), jnp.float32),   # low-branch height halo
        ],
        compiler_params=pltpu.CompilerParams(
            dimension_semantics=("parallel",)),
    )(xh, xl, wbh, wbl, bh2, bl2)

    # Lane-packed rows -> NCHW (reshape is free; single boundary transpose).
    return jnp.transpose(out_rows.reshape(N, H, W, Cout), (0, 3, 1, 2))


# ----------------------------------------------------------------------------
# Pure-JAX reference (NCHW, mirrors the PyTorch module with inference BN).
# ----------------------------------------------------------------------------
def _ref_forward(x_h, x_l, p, eps=1e-5):
    def cbr(x, w, g, b, m, v):
        y = jax.lax.conv_general_dilated(
            x, w, window_strides=(1, 1), padding=((1, 1), (1, 1)),
            dimension_numbers=("NCHW", "OIHW", "NCHW"))
        s = g / jnp.sqrt(v + eps)
        y = y * s[None, :, None, None] + (b - m * s)[None, :, None, None]
        return jnp.maximum(y, 0.0)

    y_l = cbr(x_l, p["w_l2h"], p["g_l2h"], p["b_l2h"], p["m_l2h"], p["v_l2h"])
    y_h = cbr(x_h, p["w_h2h"], p["g_h2h"], p["b_h2h"], p["m_h2h"], p["v_h2h"])
    y_l_up = jnp.repeat(jnp.repeat(y_l, 2, axis=2), 2, axis=3)
    return y_h + y_l_up


if __name__ == "__main__":
    # Module hyperparameters (matching __init__ defaults: alpha=0.25, k=3, pad=1).
    in_ch, out_ch, alpha = 8, 8, 0.25
    low_ch = int(alpha * in_ch)           # 2  -> l2h conv in-channels
    high_ch = in_ch - low_ch              # 6  -> h2h conv in-channels
    N, H, W = 2, 16, 16                   # X_h spatial; X_l is half resolution

    key = jax.random.PRNGKey(0)
    ks = jax.random.split(key, 14)

    # Inputs: x = (X_h, X_l), NCHW like PyTorch.
    x_h = jax.random.normal(ks[0], (N, high_ch, H, W), jnp.float32)
    x_l = jax.random.normal(ks[1], (N, low_ch, H // 2, W // 2), jnp.float32)

    # Deterministic parameter init (shapes from the module __init__; bias=False).
    params = {
        "w_l2h": jax.random.normal(ks[2], (out_ch, low_ch, 3, 3), jnp.float32) * 0.2,
        "g_l2h": 1.0 + 0.1 * jax.random.normal(ks[3], (out_ch,), jnp.float32),
        "b_l2h": 0.1 * jax.random.normal(ks[4], (out_ch,), jnp.float32),
        "m_l2h": 0.1 * jax.random.normal(ks[5], (out_ch,), jnp.float32),
        "v_l2h": jax.random.uniform(ks[6], (out_ch,), jnp.float32, 0.5, 1.5),
        "w_h2h": jax.random.normal(ks[7], (out_ch, high_ch, 3, 3), jnp.float32) * 0.2,
        "g_h2h": 1.0 + 0.1 * jax.random.normal(ks[8], (out_ch,), jnp.float32),
        "b_h2h": 0.1 * jax.random.normal(ks[9], (out_ch,), jnp.float32),
        "m_h2h": 0.1 * jax.random.normal(ks[10], (out_ch,), jnp.float32),
        "v_h2h": jax.random.uniform(ks[11], (out_ch,), jnp.float32, 0.5, 1.5),
    }

    out = last_octave_conv(x_h, x_l, params)
    out = jax.block_until_ready(out)

    ref = _ref_forward(x_h, x_l, params)
    assert out.shape == (N, out_ch, H, W), out.shape
    assert jnp.allclose(out, ref, atol=1e-4, rtol=1e-4), \
        float(jnp.max(jnp.abs(out - ref)))

    print("KERNEL_OK")
</pallas_src>

<mosaic_0001>
module attributes {stable_mosaic.version = 11 : i64} {
  func.func @_last_octave_kernel(%arg0: i32, %arg1: memref<1x16x96xf32, #tpu.memory_space<vmem>>, %arg2: memref<1x8x16xf32, #tpu.memory_space<vmem>>, %arg3: memref<3x96x128xf32, #tpu.memory_space<vmem>>, %arg4: memref<3x16x128xf32, #tpu.memory_space<vmem>>, %arg5: memref<1x128xf32, #tpu.memory_space<vmem>>, %arg6: memref<1x128xf32, #tpu.memory_space<vmem>>, %arg7: memref<1x16x128xf32, #tpu.memory_space<vmem>>, %arg8: memref<18x96xf32, #tpu.memory_space<vmem>>, %arg9: memref<10x16xf32, #tpu.memory_space<vmem>>) attributes {dimension_semantics = [#tpu.dimension_semantics<parallel>], iteration_bounds = array<i64: 2>, scalar_prefetch = 0 : i64, scratch_operands = 2 : i64, tpu.core_type = #tpu.core_type<tc>, window_params = [{transform_indices = @transform_0, window_bounds = array<i64: 1, 16, 96>}, {transform_indices = @transform_1, window_bounds = array<i64: 1, 8, 16>}, {pipeline_mode = #tpu.pipeline_mode<synchronous>, transform_indices = @transform_2, window_bounds = array<i64: 3, 96, 128>}, {pipeline_mode = #tpu.pipeline_mode<synchronous>, transform_indices = @transform_3, window_bounds = array<i64: 3, 16, 128>}, {pipeline_mode = #tpu.pipeline_mode<synchronous>, transform_indices = @transform_4, window_bounds = array<i64: 1, 128>}, {pipeline_mode = #tpu.pipeline_mode<synchronous>, transform_indices = @transform_5, window_bounds = array<i64: 1, 128>}, {transform_indices = @transform_6, window_bounds = array<i64: 1, 16, 128>}]} {
    %cst = arith.constant 0.000000e+00 : f32
    %0 = vector.broadcast %cst : f32 to vector<1x96xf32>
    %cst_0 = arith.constant 0.000000e+00 : f32
    %1 = vector.broadcast %cst_0 : f32 to vector<1x16xf32>
    %c0 = arith.constant 0 : index
    %c0_1 = arith.constant 0 : index
    %2 = vector.load %arg8[%c0, %c0_1] : memref<18x96xf32, #tpu.memory_space<vmem>>, vector<1x96xf32>
    tpu.vector_store %arg8[%c0, %c0_1], %0 {strides = array<i32>} : memref<18x96xf32, #tpu.memory_space<vmem>>, vector<1x96xf32>,
    %c17 = arith.constant 17 : index
    %c0_2 = arith.constant 0 : index
    %3 = vector.load %arg8[%c17, %c0_2] : memref<18x96xf32, #tpu.memory_space<vmem>>, vector<1x96xf32>
    tpu.vector_store %arg8[%c17, %c0_2], %0 {strides = array<i32>} : memref<18x96xf32, #tpu.memory_space<vmem>>, vector<1x96xf32>,
    %c0_3 = arith.constant 0 : index
    %c0_4 = arith.constant 0 : index
    %4 = vector.load %arg9[%c0_3, %c0_4] : memref<10x16xf32, #tpu.memory_space<vmem>>, vector<1x16xf32>
    tpu.vector_store %arg9[%c0_3, %c0_4], %1 {strides = array<i32>} : memref<10x16xf32, #tpu.memory_space<vmem>>, vector<1x16xf32>,
    %c9 = arith.constant 9 : index
    %c0_5 = arith.constant 0 : index
    %5 = vector.load %arg9[%c9, %c0_5] : memref<10x16xf32, #tpu.memory_space<vmem>>, vector<1x16xf32>
    tpu.vector_store %arg9[%c9, %c0_5], %1 {strides = array<i32>} : memref<10x16xf32, #tpu.memory_space<vmem>>, vector<1x16xf32>,
    %c0_6 = arith.constant 0 : index
    %c0_7 = arith.constant 0 : index
    %c0_8 = arith.constant 0 : index
    %6 = vector.load %arg1[%c0_6, %c0_7, %c0_8] : memref<1x16x96xf32, #tpu.memory_space<vmem>>, vector<1x16x96xf32>
    %7 = vector.shape_cast %6 : vector<1x16x96xf32> to vector<16x96xf32>
    %c1 = arith.constant 1 : index
    %c0_9 = arith.constant 0 : index
    %8 = vector.load %arg8[%c1, %c0_9] : memref<18x96xf32, #tpu.memory_space<vmem>>, vector<16x96xf32>
    tpu.vector_store %arg8[%c1, %c0_9], %7 {strides = array<i32>} : memref<18x96xf32, #tpu.memory_space<vmem>>, vector<16x96xf32>,
    %c0_10 = arith.constant 0 : index
    %c0_11 = arith.constant 0 : index
    %c0_12 = arith.constant 0 : index
    %9 = vector.load %arg2[%c0_10, %c0_11, %c0_12] : memref<1x8x16xf32, #tpu.memory_space<vmem>>, vector<1x8x16xf32>
    %10 = vector.shape_cast %9 : vector<1x8x16xf32> to vector<8x16xf32>
    %c1_13 = arith.constant 1 : index
    %c0_14 = arith.constant 0 : index
    %11 = vector.load %arg9[%c1_13, %c0_14] : memref<10x16xf32, #tpu.memory_space<vmem>>, vector<8x16xf32>
    tpu.vector_store %arg9[%c1_13, %c0_14], %10 {strides = array<i32>} : memref<10x16xf32, #tpu.memory_space<vmem>>, vector<8x16xf32>,
    %c0_15 = arith.constant 0 : index
    %c0_16 = arith.constant 0 : index
    %12 = vector.load %arg9[%c0_15, %c0_16] : memref<10x16xf32, #tpu.memory_space<vmem>>, vector<8x16xf32>
    %c0_17 = arith.constant 0 : index
    %c0_18 = arith.constant 0 : index
    %c0_19 = arith.constant 0 : index
    %13 = vector.load %arg4[%c0_17, %c0_18, %c0_19] : memref<3x16x128xf32, #tpu.memory_space<vmem>>, vector<1x16x128xf32>
    %14 = vector.shape_cast %13 : vector<1x16x128xf32> to vector<16x128xf32>
    %cst_20 = arith.constant dense<0.000000e+00> : vector<8x128xf32>
    %15 = tpu.matmul %12, %14, %cst_20 {dimension_numbers = #tpu.dot_dimension_numbers<[1], [0], [0], [1], [0, 0, 1, 1], [], []>} : vector<8x16xf32>, vector<16x128xf32>, vector<8x128xf32> -> vector<8x128xf32>
    %c1_21 = arith.constant 1 : index
    %c0_22 = arith.constant 0 : index
    %16 = vector.load %arg9[%c1_21, %c0_22] : memref<10x16xf32, #tpu.memory_space<vmem>>, vector<8x16xf32>
    %c1_23 = arith.constant 1 : index
    %c0_24 = arith.constant 0 : index
    %c0_25 = arith.constant 0 : index
    %17 = vector.load %arg4[%c1_23, %c0_24, %c0_25] : memref<3x16x128xf32, #tpu.memory_space<vmem>>, vector<1x16x128xf32>
    %18 = vector.shape_cast %17 : vector<1x16x128xf32> to vector<16x128xf32>
    %cst_26 = arith.constant dense<0.000000e+00> : vector<8x128xf32>
    %19 = tpu.matmul %16, %18, %cst_26 {dimension_numbers = #tpu.dot_dimension_numbers<[1], [0], [0], [1], [0, 0, 1, 1], [], []>} : vector<8x16xf32>, vector<16x128xf32>, vector<8x128xf32> -> vector<8x128xf32>
    %20 = arith.addf %15, %19 : vector<8x128xf32>
    %c2 = arith.constant 2 : index
    %c0_27 = arith.constant 0 : index
    %21 = vector.load %arg9[%c2, %c0_27] : memref<10x16xf32, #tpu.memory_space<vmem>>, vector<8x16xf32>
    %c2_28 = arith.constant 2 : index
    %c0_29 = arith.constant 0 : index
    %c0_30 = arith.constant 0 : index
    %22 = vector.load %arg4[%c2_28, %c0_29, %c0_30] : memref<3x16x128xf32, #tpu.memory_space<vmem>>, vector<1x16x128xf32>
    %23 = vector.shape_cast %22 : vector<1x16x128xf32> to vector<16x128xf32>
    %cst_31 = arith.constant dense<0.000000e+00> : vector<8x128xf32>
    %24 = tpu.matmul %21, %23, %cst_31 {dimension_numbers = #tpu.dot_dimension_numbers<[1], [0], [0], [1], [0, 0, 1, 1], [], []>} : vector<8x16xf32>, vector<16x128xf32>, vector<8x128xf32> -> vector<8x128xf32>
    %25 = arith.addf %20, %24 : vector<8x128xf32>
    %c0_32 = arith.constant 0 : index
    %c0_33 = arith.constant 0 : index
    %26 = vector.load %arg6[%c0_32, %c0_33] : memref<1x128xf32, #tpu.memory_space<vmem>>, vector<1x128xf32>
    %27 = vector.broadcast %26 : vector<1x128xf32> to vector<8x128xf32>
    %28 = arith.addf %25, %27 : vector<8x128xf32>
    %cst_34 = arith.constant 0.000000e+00 : f32
    %29 = vector.broadcast %cst_34 : f32 to vector<8x128xf32>
    %30 = arith.maximumf %28, %29 : vector<8x128xf32>
    %c0_35 = arith.constant 0 : index
    %c0_36 = arith.constant 0 : index
    %31 = vector.load %arg8[%c0_35, %c0_36] : memref<18x96xf32, #tpu.memory_space<vmem>>, vector<16x96xf32>
    %c0_37 = arith.constant 0 : index
    %c0_38 = arith.constant 0 : index
    %c0_39 = arith.constant 0 : index
    %32 = vector.load %arg3[%c0_37, %c0_38, %c0_39] : memref<3x96x128xf32, #tpu.memory_space<vmem>>, vector<1x96x128xf32>
    %33 = vector.shape_cast %32 : vector<1x96x128xf32> to vector<96x128xf32>
    %cst_40 = arith.constant dense<0.000000e+00> : vector<16x128xf32>
    %34 = tpu.matmul %31, %33, %cst_40 {dimension_numbers = #tpu.dot_dimension_numbers<[1], [0], [0], [1], [0, 0, 1, 1], [], []>} : vector<16x96xf32>, vector<96x128xf32>, vector<16x128xf32> -> vector<16x128xf32>
    %c1_41 = arith.constant 1 : index
    %c0_42 = arith.constant 0 : index
    %35 = vector.load %arg8[%c1_41, %c0_42] : memref<18x96xf32, #tpu.memory_space<vmem>>, vector<16x96xf32>
    %c1_43 = arith.constant 1 : index
    %c0_44 = arith.constant 0 : index
    %c0_45 = arith.constant 0 : index
    %36 = vector.load %arg3[%c1_43, %c0_44, %c0_45] : memref<3x96x128xf32, #tpu.memory_space<vmem>>, vector<1x96x128xf32>
    %37 = vector.shape_cast %36 : vector<1x96x128xf32> to vector<96x128xf32>
    %cst_46 = arith.constant dense<0.000000e+00> : vector<16x128xf32>
    %38 = tpu.matmul %35, %37, %cst_46 {dimension_numbers = #tpu.dot_dimension_numbers<[1], [0], [0], [1], [0, 0, 1, 1], [], []>} : vector<16x96xf32>, vector<96x128xf32>, vector<16x128xf32> -> vector<16x128xf32>
    %39 = arith.addf %34, %38 : vector<16x128xf32>
    %c2_47 = arith.constant 2 : index
    %c0_48 = arith.constant 0 : index
    %40 = vector.load %arg8[%c2_47, %c0_48] : memref<18x96xf32, #tpu.memory_space<vmem>>, vector<16x96xf32>
    %c2_49 = arith.constant 2 : index
    %c0_50 = arith.constant 0 : index
    %c0_51 = arith.constant 0 : index
    %41 = vector.load %arg3[%c2_49, %c0_50, %c0_51] : memref<3x96x128xf32, #tpu.memory_space<vmem>>, vector<1x96x128xf32>
    %42 = vector.shape_cast %41 : vector<1x96x128xf32> to vector<96x128xf32>
    %cst_52 = arith.constant dense<0.000000e+00> : vector<16x128xf32>
    %43 = tpu.matmul %40, %42, %cst_52 {dimension_numbers = #tpu.dot_dimension_numbers<[1], [0], [0], [1], [0, 0, 1, 1], [], []>} : vector<16x96xf32>, vector<96x128xf32>, vector<16x128xf32> -> vector<16x128xf32>
    %44 = arith.addf %39, %43 : vector<16x128xf32>
    %c0_53 = arith.constant 0 : index
    %c0_54 = arith.constant 0 : index
    %45 = vector.load %arg5[%c0_53, %c0_54] : memref<1x128xf32, #tpu.memory_space<vmem>>, vector<1x128xf32>
    %46 = vector.broadcast %45 : vector<1x128xf32> to vector<16x128xf32>
    %47 = arith.addf %44, %46 : vector<16x128xf32>
    %cst_55 = arith.constant 0.000000e+00 : f32
    %48 = vector.broadcast %cst_55 : f32 to vector<16x128xf32>
    %49 = arith.maximumf %47, %48 : vector<16x128xf32>
    %50 = vector.shape_cast %30 : vector<8x128xf32> to vector<8x1x128xf32>
    %51 = vector.shape_cast %50 : vector<8x1x128xf32> to vector<8x1x128xf32>
    %52 = vector.broadcast %51 : vector<8x1x128xf32> to vector<8x2x128xf32>
    %53 = vector.shape_cast %52 : vector<8x2x128xf32> to vector<16x128xf32>
    %54 = arith.addf %49, %53 : vector<16x128xf32>
    %c0_56 = arith.constant 0 : index
    %c0_57 = arith.constant 0 : index
    %c0_58 = arith.constant 0 : index
    %55 = vector.load %arg7[%c0_56, %c0_57, %c0_58] : memref<1x16x128xf32, #tpu.memory_space<vmem>>, vector<1x16x128xf32>
    %56 = vector.shape_cast %55 : vector<1x16x128xf32> to vector<16x128xf32>
    %57 = vector.shape_cast %54 : vector<16x128xf32> to vector<1x16x128xf32>
    tpu.vector_store %arg7[%c0_56, %c0_57, %c0_58], %57 {strides = array<i32>} : memref<1x16x128xf32, #tpu.memory_space<vmem>>, vector<1x16x128xf32>,
    return
  }
  func.func @transform_0(%arg0: i32) -> (i32, i32, i32) {
    %c0_i32 = arith.constant 0 : i32
    %c0_i32_0 = arith.constant 0 : i32
    %c0_i32_1 = arith.constant 0 : i32
    return %arg0, %c0_i32, %c0_i32_0 : i32, i32, i32
  }
  func.func @transform_1(%arg0: i32) -> (i32, i32, i32) {
    %c0_i32 = arith.constant 0 : i32
    %c0_i32_0 = arith.constant 0 : i32
    %c0_i32_1 = arith.constant 0 : i32
    return %arg0, %c0_i32, %c0_i32_0 : i32, i32, i32
  }
  func.func @transform_2(%arg0: i32) -> (i32, i32, i32) {
    %c0_i32 = arith.constant 0 : i32
    %c0_i32_0 = arith.constant 0 : i32
    %c0_i32_1 = arith.constant 0 : i32
    %c0_i32_2 = arith.constant 0 : i32
    return %c0_i32, %c0_i32_0, %c0_i32_1 : i32, i32, i32
  }
  func.func @transform_3(%arg0: i32) -> (i32, i32, i32) {
    %c0_i32 = arith.constant 0 : i32
    %c0_i32_0 = arith.constant 0 : i32
    %c0_i32_1 = arith.constant 0 : i32
    %c0_i32_2 = arith.constant 0 : i32
    return %c0_i32, %c0_i32_0, %c0_i32_1 : i32, i32, i32
  }
  func.func @transform_4(%arg0: i32) -> (i32, i32) {
    %c0_i32 = arith.constant 0 : i32
    %c0_i32_0 = arith.constant 0 : i32
    %c0_i32_1 = arith.constant 0 : i32
    return %c0_i32, %c0_i32_0 : i32, i32
  }
  func.func @transform_5(%arg0: i32) -> (i32, i32) {
    %c0_i32 = arith.constant 0 : i32
    %c0_i32_0 = arith.constant 0 : i32
    %c0_i32_1 = arith.constant 0 : i32
    return %c0_i32, %c0_i32_0 : i32, i32
  }
  func.func @transform_6(%arg0: i32) -> (i32, i32, i32) {
    %c0_i32 = arith.constant 0 : i32
    %c0_i32_0 = arith.constant 0 : i32
    %c0_i32_1 = arith.constant 0 : i32
    return %arg0, %c0_i32, %c0_i32_0 : i32, i32, i32
  }
}

</mosaic_0001>

<bundles_post_ra>
// kernel: tile.13
= control target key start
LH: loop header
LB: loop body
LE: loop exit
PB: predicated region body
PF: predicated region fallthrough
CT: control target
= control target key end

     0   :  { %s28_s0 = inlined_call_operand.vmem [shape: f32[8], index: 0, kind: input, shape index: {}]   ;;  %s29_s1 = inlined_call_operand.vmem [shape: f32[16,8], index: 1, kind: output, shape index: {}]  }
   0x1   :  { %v4_v0 = vld [vmem:[%s28_s0] ss:$0 sm:$0xff] }
   0x2   :  { %5 = vst [vmem:[%s29_s1] sm:$0xff] %v4_v0  ;;  %8 = vst [vmem:[%s29_s1 + $0x8] sm:$0xff] %v4_v0 }

// kernel: tile.14
= control target key start
LH: loop header
LB: loop body
LE: loop exit
PB: predicated region body
PF: predicated region fallthrough
CT: control target
= control target key end

     0   :  { %s133_s10 = smov 120   ;;  %s134_s11 = smov 104   ;;  %vm3_vm0 = vcmask 64512   ;;  %vm9_vm1 = vcmask 1048512   ;;  %vm15_vm2 = vcmask 982912   ;;  %vm21_vm3 = vcmask 917312   ;;  %s209_s0 = inlined_call_operand.vmem [shape: f32[16,8], index: 0, kind: input, shape index: {}]   ;;  %s210_s1 = inlined_call_operand.vmem [shape: f32[1,128], index: 1, kind: output, shape index: {}]  }
   0x1   :  { %v103_v0 = vld [vmem:[%s209_s0 + $0xf] sm:$0x1]   ;;  %v105_v1 = vld [vmem:[%s209_s0 + $0xd] sm:$0x1]   ;;  %v104_v2 = vld [vmem:[%s209_s0 + $0xe] sm:$0x1]  }
   0x2   :  { %7 = vrot.lane.b32.xlu0 %v103_v0, %s133_s10  ;;  %19 = vrot.lane.b32.xlu1 %v105_v1, %s134_s11  ;;  %v106_v3 = vld [vmem:[%s209_s0 + $0xc] sm:$0x1]   ;;  %s135_s16 = smov 112   ;;  %s136_s17 = smov 96   ;;  %v107_v4 = vld [vmem:[%s209_s0 + $0xb] sm:$0x1]  }
   0x3   :  { %v108_v5 = vld [vmem:[%s209_s0 + $0xa] sm:$0x1]   ;;  %v2_v6 = vld [vmem:[%s209_s0] sm:$0x1]   ;;  %s137_s24 = smov 88   ;;  %s138_s25 = smov 80  }
   0x4   :  { %4 = vst.msk [vmem:[#allocation0] sm:$0x1] %vm3_vm0, %v2_v6   ;;  %v109_v7 = vld [vmem:[%s209_s0 + $0x9] sm:$0x1]   ;;  %v110_v8 = vld [vmem:[%s209_s0 + $0x8] sm:$0x1]  }
   0x5   :  { %s139_s30 = smov 72   ;;  %s140_s2 = smov 64   ;;  %v111_v9 = vld [vmem:[%s209_s0 + $0x7] sm:$0x1]   ;;  %v112_v10 = vld [vmem:[%s209_s0 + $0x6] sm:$0x1]  }
   0x6   :  { %13 = vrot.lane.b32.xlu0 %v104_v2, %s135_s16  ;;  %25 = vrot.lane.b32.xlu1 %v106_v3, %s136_s17  ;;  %s141_s7 = smov 56   ;;  %s142_s8 = smov 48   ;;  %v113_v11 = vld [vmem:[%s209_s0 + $0x5] sm:$0x1]   ;;  %v114_v12 = vld [vmem:[%s209_s0 + $0x4] sm:$0x1]  }
   0x7   :  { %s143_s13 = smov 40   ;;  %s144_s14 = smov 32   ;;  %v115_v13 = vld [vmem:[%s209_s0 + $0x3] sm:$0x1]   ;;  %v116_v14 = vld [vmem:[%s209_s0 + $0x2] sm:$0x1]  }
   0x8   :  { %s145_s19 = smov 24   ;;  %s146_s20 = smov 16   ;;  %v117_v15 = vld [vmem:[%s209_s0 + $0x1] sm:$0x1]   ;;  %vm27_vm4 = vcmask 851712   ;;  %vm33_vm5 = vcmask 786112  }
   0x9   :  { %s147_s0 = smov 8   ;;  %vm39_vm6 = vcmask 720512   ;;  %vm45_vm7 = vcmask 654912   ;;  %vm51_vm8 = vcmask 589312   ;;  %vm57_vm9 = vcmask 523712  }
   0xa   :  { %31 = vrot.lane.b32.xlu0 %v107_v4, %s137_s24  ;;  %37 = vrot.lane.b32.xlu1 %v108_v5, %s138_s25  ;;  %vm63_vm10 = vcmask 458112   ;;  %vm69_vm11 = vcmask 392512   ;;  %vm75_vm12 = vcmask 326912   ;;  %vm81_vm13 = vcmask 261312  }
   0xb   :  { %vm87_vm14 = vcmask 195712   ;;  %vm93_vm15 = vcmask 130112  }
   0xe   :  { %43 = vrot.lane.b32.xlu0 %v109_v7, %s139_s30  ;;  %49 = vrot.lane.b32.xlu1 %v110_v8, %s140_s2 }
  0x12   :  { %55 = vrot.lane.b32.xlu0 %v111_v9, %s141_s7  ;;  %61 = vrot.lane.b32.xlu1 %v112_v10, %s142_s8 }
  0x16   :  { %67 = vrot.lane.b32.xlu0 %v113_v11, %s143_s13  ;;  %73 = vrot.lane.b32.xlu1 %v114_v12, %s144_s14 }
  0x1a   :  { %79 = vrot.lane.b32.xlu0 %v115_v13, %s145_s19  ;;  %85 = vrot.lane.b32.xlu1 %v116_v14, %s146_s20 }
  0x1e   :  { %91 = vrot.lane.b32.xlu0 %v117_v15, %s147_s0 }
  0x74   :  { %v8_v16 = vpop.permute.xlu0 %7   ;;  %v20_v17 = vpop.permute.xlu1 %19  }
  0x75   :  { %10 = vst.msk [vmem:[#allocation0] sm:$0x1] %vm9_vm1, %v8_v16  }
  0x78   :  { %v14_v18 = vpop.permute.xlu0 %13   ;;  %v26_v19 = vpop.permute.xlu1 %25  }
  0x79   :  { %16 = vst.msk [vmem:[#allocation0] sm:$0x1] %vm15_vm2, %v14_v18  }
  0x7a   :  { %22 = vst.msk [vmem:[#allocation0] sm:$0x1] %vm21_vm3, %v20_v17  }
  0x7b   :  { %28 = vst.msk [vmem:[#allocation0] sm:$0x1] %vm27_vm4, %v26_v19  }
  0x7c   :  { %v32_v20 = vpop.permute.xlu0 %31   ;;  %v38_v21 = vpop.permute.xlu1 %37  }
  0x7d   :  { %34 = vst.msk [vmem:[#allocation0] sm:$0x1] %vm33_vm5, %v32_v20  }
  0x7e   :  { %40 = vst.msk [vmem:[#allocation0] sm:$0x1] %vm39_vm6, %v38_v21  }
  0x80   :  { %v44_v22 = vpop.permute.xlu0 %43   ;;  %v50_v23 = vpop.permute.xlu1 %49  }
  0x81   :  { %46 = vst.msk [vmem:[#allocation0] sm:$0x1] %vm45_vm7, %v44_v22  }
  0x82   :  { %52 = vst.msk [vmem:[#allocation0] sm:$0x1] %vm51_vm8, %v50_v23  }
  0x84   :  { %v56_v24 = vpop.permute.xlu0 %55   ;;  %v62_v25 = vpop.permute.xlu1 %61  }
  0x85   :  { %58 = vst.msk [vmem:[#allocation0] sm:$0x1] %vm57_vm9, %v56_v24  }
  0x86   :  { %64 = vst.msk [vmem:[#allocation0] sm:$0x1] %vm63_vm10, %v62_v25  }
  0x88   :  { %v68_v26 = vpop.permute.xlu0 %67   ;;  %v74_v27 = vpop.permute.xlu1 %73  }
  0x89   :  { %70 = vst.msk [vmem:[#allocation0] sm:$0x1] %vm69_vm11, %v68_v26  }
  0x8a   :  { %76 = vst.msk [vmem:[#allocation0] sm:$0x1] %vm75_vm12, %v74_v27  }
  0x8c   :  { %v80_v28 = vpop.permute.xlu0 %79   ;;  %v86_v29 = vpop.permute.xlu1 %85  }
  0x8d   :  { %82 = vst.msk [vmem:[#allocation0] sm:$0x1] %vm81_vm13, %v80_v28  }
  0x8e   :  { %88 = vst.msk [vmem:[#allocation0] sm:$0x1] %vm87_vm14, %v86_v29  }
  0x90   :  { %v92_v30 = vpop.permute.xlu0 %91  }
  0x91   :  { %94 = vst.msk [vmem:[#allocation0] sm:$0x1] %vm93_vm15, %v92_v30  }
  0x98   :  { %v99_v31 = vld [vmem:[#allocation0] sm:$0x1] }
  0x99   :  { %102 = vst [vmem:[%s210_s1] sm:$0x1] %v99_v31 }

// kernel: last_octave_conv.1
= control target key start
LH: loop header
LB: loop body
LE: loop exit
PB: predicated region body
PF: predicated region fallthrough
CT: control target
= control target key end

     0   :  { %s1277_s21 = smov 0   ;;  %s1465_s0 = inlined_call_operand.vmem [shape: f32[2,16,96], index: 0, kind: input, shape index: {}]   ;;  %s1466_s1 = inlined_call_operand.vmem [shape: f32[2,8,16], index: 1, kind: input, shape index: {}]   ;;  %s1467_s2 = inlined_call_operand.vmem [shape: f32[3,96,128], index: 2, kind: input, shape index: {}]   ;;  %s1468_s3 = inlined_call_operand.vmem [shape: f32[3,16,128], index: 3, kind: input, shape index: {}]   ;;  %s1469_s4 = inlined_call_operand.vmem [shape: f32[1,128], index: 4, kind: input, shape index: {}]   ;;  %s1470_s5 = inlined_call_operand.vmem [shape: f32[1,128], index: 5, kind: input, shape index: {}]   ;;  %s1471_s6 = inlined_call_operand.vmem [shape: f32[2,16,128], index: 6, kind: output, shape index: {}]  }
   0x1 LB: > { %s1012_s22 = sadd.s32 4294967295, %s1236_s21   ;;  %p1016_p0 = scmp.ge.s32.totalorder %s1236_s21, 1  ;;  %s1236_s21 = sphi %s1277_s21, %s16_s21  }
   0x2   : > { %p221_p1 = scmp.lt.s32.totalorder %s1236_s21, 3 }
   0x4   : > { %p222_p2 = pnand %p1016_p0, %p221_p1 }
   0x5   : > { %p255_p3 = scmp.lt.s32.totalorder (!%p222_p2), %s1012_s22, 1 }
   0x6   : > { %225 = sbr.rel (%p222_p2) target bundleno = 267 (0x10b), region = 44 }
   0xb   : > { %v1041_v0 = vld [vmem:[%s1467_s2 + $0xb8] sm:$0xff]  ;;  %v1040_v1 = vld [vmem:[%s1467_s2 + $0xb0] sm:$0xff]  ;;  %v1238_v2 = vmov 0.0   ;;  %vm272_vm0 = vcmask 122880   ;;  %v1039_v4 = vld [vmem:[%s1467_s2 + $0xa8] sm:$0xff]  ;;  %s1473_s22 = smov (!%p255_p3, %s1012_s22), 1  ;;  %v828_v60 = vlaneseq }
   0xc   : > { %1137 = vmatprep.subr.mxu1 %v1041_v0  ;;  %1116 = vmatprep.subr.mxu0 %v1238_v2  ;;  %v1023_v3 = vld [vmem:[%s1468_s3 + $0x18] sm:$0xff]  ;;  %v1022_v5 = vld [vmem:[%s1468_s3 + $0x10] sm:$0xff]  ;;  %273 = vst.msk [vmem:[#allocation3] sm:$0x1] %vm272_vm0, %v1238_v2  ;;  %274 = vst.msk [vmem:[#allocation3 + $0x9] sm:$0x1] %vm272_vm0, %v1238_v2 }
   0xd   : > { %1138 = vmatpush3.msra.mxu1 %v1041_v0  ;;  %1117 = vmatpush3.msra.mxu0 %v1023_v3  ;;  %vm269_vm1 = vcmask 778240   ;;  %v1038_v6 = vld [vmem:[%s1467_s2 + $0xa0] sm:$0xff]  ;;  %s1063_s11 = sshll.u32 %s1473_s22, 4  ;;  %s1019_s12 = sshll.u32 %s1473_s22, 3  ;;  %vm281_vm2 = vcmask 130048   ;;  %vm277_vm3 = vcmask 785408  }
   0xe   : > { %1139 = vmatprep.subr.mxu1 %v1040_v1  ;;  %1118 = vmatprep.subr.mxu0 %v1238_v2  ;;  %270 = vst.msk [vmem:[#allocation2] sm:$0x1] %vm269_vm1, %v1238_v2  ;;  %271 = vst.msk [vmem:[#allocation2 + $0x11] sm:$0x1] %vm269_vm1, %v1238_v2  ;;  %v1037_v7 = vld [vmem:[%s1467_s2 + $0x98] sm:$0xff]  ;;  %vm1239_vm4 = vmmov 0   ;;  %s259_s17 = scalar_lea.vmem %s1465_s0, %s1063_s11  ;;  %s263_s20 = scalar_lea.vmem %s1466_s1, %s1019_s12 }
   0xf   : > { %1140 = vmatpush3.msra.mxu1 %v1040_v1  ;;  %1119 = vmatpush3.msra.mxu0 %v1022_v5  ;;  %v275_v8 = vld [vmem:[%s259_s17] sm:$0xff]  ;;  %v276_v9 = vld [vmem:[%s259_s17 + $0x8] sm:$0xff]  ;;  %v1036_v11 = vld [vmem:[%s1467_s2 + $0x90] sm:$0xff]  ;;  %v1240_v58 = vmov 1966171168   ;;  %v829_v0 = vshrl.u32 %v828_v60, 7  ;;  %s268_s13 = scalar_lea.vmem %s1471_s6, %s1063_s11 }
  0x10   : > { %1141 = vmatprep.subr.mxu1 %v1039_v4  ;;  %1120 = vmatprep.mubr.msk.f32.mxu0 %vm1239_vm4, %v1238_v2  ;;  %v280_v10 = vld [vmem:[%s263_s20] sm:$0xff]  ;;  %278 = vst.msk [vmem:[#allocation2 + $0x1] sm:$0xff] %vm277_vm3, %v275_v8  ;;  %279 = vst.msk [vmem:[#allocation2 + $0x9] sm:$0xff] %vm277_vm3, %v276_v9  ;;  %v1035_v12 = vld [vmem:[%s1467_s2 + $0x88] sm:$0xff]  ;;  %v826_v59 = vunpack.c.l.s4 %v1240_v58 }
  0x11   : > { %1142 = vmatpush3.msra.mxu1 %v1039_v4  ;;  %1123 = vmatprep.subr.mxu0 %v1238_v2  ;;  %282 = vst.msk [vmem:[#allocation3 + $0x1] sm:$0xff] %vm281_vm2, %v280_v10  ;;  %v1034_v13 = vld [vmem:[%s1467_s2 + $0x80] sm:$0xff]  ;;  %v285_v14 = vld [vmem:[%s1468_s3 + $0x8] sm:$0xff]  ;;  %v1033_v16 = vld [vmem:[%s1467_s2 + $0x78] sm:$0xff] }
  0x12   : > { %1143 = vmatprep.subr.mxu1 %v1038_v6  ;;  %v284_v17 = vld [vmem:[%s1468_s3] sm:$0xff]  ;;  %v1032_v19 = vld [vmem:[%s1467_s2 + $0x70] sm:$0xff]  ;;  %v1027_v20 = vld [vmem:[%s1468_s3 + $0x28] sm:$0xff]  ;;  %v827_v63 = vunpack.c.0.s8 %v826_v59 }
  0x13   : > { %1144 = vmatpush3.msra.mxu1 %v1038_v6  ;;  %v1031_v21 = vld [vmem:[%s1467_s2 + $0x68] sm:$0xff]  ;;  %v1026_v22 = vld [vmem:[%s1468_s3 + $0x20] sm:$0xff]  ;;  %v536_v23 = vld [vmem:[%s1467_s2 + $0x58] sm:$0xff] }
  0x14   : > { %1145 = vmatprep.subr.mxu1 %v1037_v7  ;;  %v1030_v25 = vld [vmem:[%s1467_s2 + $0x60] sm:$0xff]  ;;  %v535_v27 = vld [vmem:[%s1467_s2 + $0x50] sm:$0xff]  ;;  %v1057_v29 = vld [vmem:[%s1467_s2 + $0x118] sm:$0xff]  ;;  %v830_v6 = vsub.s32 %v827_v63, %v829_v0 }
  0x15   : > { %1146 = vmatpush3.msra.mxu1 %v1037_v7  ;;  %v534_v30 = vld [vmem:[%s1467_s2 + $0x48] sm:$0xff]  ;;  %v1056_v31 = vld [vmem:[%s1467_s2 + $0x110] sm:$0xff]  ;;  %v533_v32 = vld [vmem:[%s1467_s2 + $0x40] sm:$0xff] }
  0x16   : > { %1147 = vmatprep.subr.mxu1 %v1036_v11  ;;  %v1055_v33 = vld [vmem:[%s1467_s2 + $0x108] sm:$0xff]  ;;  %v532_v34 = vld [vmem:[%s1467_s2 + $0x38] sm:$0xff]  ;;  %v1054_v35 = vld [vmem:[%s1467_s2 + $0x100] sm:$0xff] }
  0x17   : > { %1148 = vmatpush3.msra.mxu1 %v1036_v11  ;;  %v537_v26 = vld [vmem:[#allocation2 + $0x1] sm:$0xff]  ;;  %v538_v28 = vld [vmem:[#allocation2 + $0x9] sm:$0xff]  ;;  %v1053_v37 = vld [vmem:[%s1467_s2 + $0xf8] sm:$0xff] }
  0x18   : > { %1149 = vmatprep.subr.mxu1 %v1035_v12  ;;  %v286_v15 = vld [vmem:[#allocation3 + $0x1] sm:$0xff]  ;;  %1161 = vmatprep.mubr.msk.f32.mxu1 %vm277_vm3, %v537_v26  ;;  %v531_v36 = vld [vmem:[%s1467_s2 + $0x30] sm:$0xff]  ;;  %v530_v38 = vld [vmem:[%s1467_s2 + $0x28] sm:$0xff] }
  0x19   : > { %1150 = vmatpush3.msra.mxu1 %v1035_v12  ;;  %1121 = vmatmul.mubr.msk.f32.vlgmr.msra.gmra.mxu0 %vm281_vm2, %v286_v15  ;;  %v283_v18 = vld [vmem:[#allocation3] sm:$0xff]  ;;  %v1052_v39 = vld [vmem:[%s1467_s2 + $0xf0] sm:$0xff]  ;;  %v529_v40 = vld [vmem:[%s1467_s2 + $0x20] sm:$0xff] }
  0x1a   : > { %1151 = vmatprep.subr.mxu1 %v1034_v13  ;;  %1124 = vmatpush3.msra.mxu0 %v285_v14  ;;  %v436_v24 = vld [vmem:[#allocation3 + $0x2] sm:$0xff]  ;;  %v1051_v41 = vld [vmem:[%s1467_s2 + $0xe8] sm:$0xff]  ;;  %v527_v44 = vld [vmem:[%s1467_s2 + $0x10] sm:$0xff] }
  0x1b   : > { %1152 = vmatpush3.msra.mxu1 %v1034_v13  ;;  %1125 = vmatprep.subr.mxu0 %v1238_v2  ;;  %v528_v42 = vld [vmem:[%s1467_s2 + $0x18] sm:$0xff]  ;;  %v1050_v43 = vld [vmem:[%s1467_s2 + $0xe0] sm:$0xff]  ;;  %v526_v46 = vld [vmem:[%s1467_s2 + $0x8] sm:$0xff] }
  0x1c   : > { %1153 = vmatprep.subr.mxu1 %v1033_v16  ;;  %1126 = vmatpush3.msra.mxu0 %v284_v17  ;;  %v1049_v45 = vld [vmem:[%s1467_s2 + $0xd8] sm:$0xff]  ;;  %v1048_v47 = vld [vmem:[%s1467_s2 + $0xd0] sm:$0xff]  ;;  %v525_v48 = vld [vmem:[%s1467_s2] sm:$0xff] }
  0x1d   : > { %1127 = vmatprep.mubr.msk.f32.mxu0 %vm1239_vm4, %v1238_v2  ;;  %1130 = vmatprep.subr.mxu0 %v1238_v2  ;;  %v523_v49 = vld [vmem:[#allocation2] sm:$0xff]  ;;  %v1047_v50 = vld [vmem:[%s1467_s2 + $0xc8] sm:$0xff] }
  0x1e   : > { %1154 = vmatpush3.msra.mxu1 %v1033_v16  ;;  %1128 = vmatmul.mubr.msk.f32.vlgmr.msra.gmra.mxu0 %vm281_vm2, %v283_v18  ;;  %v524_v51 = vld [vmem:[#allocation2 + $0x8] sm:$0xff]  ;;  %v1046_v52 = vld [vmem:[%s1467_s2 + $0xc0] sm:$0xff] }
  0x1f   : > { %1155 = vmatprep.subr.mxu1 %v1032_v19  ;;  %1131 = vmatpush3.msra.mxu0 %v1027_v20  ;;  %v714_v53 = vld [vmem:[#allocation2 + $0x2] sm:$0xff]  ;;  %v715_v54 = vld [vmem:[#allocation2 + $0xa] sm:$0xff]  ;;  %v875_v20 = vsub.s32 0, %v829_v0 }
  0x20   : > { %1156 = vmatpush3.msra.mxu1 %v1032_v19  ;;  %1132 = vmatprep.subr.mxu0 %v1238_v2 }
  0x21   : > { %1157 = vmatprep.subr.mxu1 %v1031_v21  ;;  %1133 = vmatpush3.msra.mxu0 %v1026_v22 }
  0x22   : > { %1134 = vmatprep.mubr.msk.f32.mxu0 %vm1239_vm4, %v1238_v2  ;;  %1158 = vmatpush3.msra.mxu1 %v1031_v21  ;;  %v1029_v2 = vld [vmem:[%s1470_s5] ss:$0 sm:$0xff]  ;;  %v1241_v21 = vmov 1983009808  }
  0x23   : > { %1164 = vmatprep.subr.mxu0 %v536_v23  ;;  %1135 = vmatmul.mubr.msk.f32.vlgmr.msra.gmra.mxu0 %vm281_vm2, %v436_v24  ;;  %v908_v22 = vunpack.c.l.s4 %v1241_v21 }
  0x24   : > { %1159 = vmatprep.subr.mxu1 %v1030_v25  ;;  %1165 = vmatpush3.msra.mxu0 %v536_v23 }
  0x25   : > { %1160 = vmatpush3.msra.mxu1 %v1030_v25  ;;  %1166 = vmatprep.subr.mxu0 %v535_v27 }
  0x26   : > { %1162 = vmatmul.mubr.msk.f32.vlgmr.msra.gmra.mxu1 %vm277_vm3, %v538_v28  ;;  %1167 = vmatpush3.msra.mxu0 %v535_v27  ;;  %v909_v28 = vunpack.c.0.s8 %v908_v22 }
  0x27   : > { %1191 = vmatprep.subr.mxu1 %v1057_v29  ;;  %1168 = vmatprep.subr.mxu0 %v534_v30 }
  0x28   : > { %1192 = vmatpush3.msra.mxu1 %v1057_v29  ;;  %1169 = vmatpush3.msra.mxu0 %v534_v30 }
  0x29   : > { %1193 = vmatprep.subr.mxu1 %v1056_v31  ;;  %1170 = vmatprep.subr.mxu0 %v533_v32 }
  0x2a   : > { %1194 = vmatpush3.msra.mxu1 %v1056_v31  ;;  %1171 = vmatpush3.msra.mxu0 %v533_v32 }
  0x2b   : > { %1195 = vmatprep.subr.mxu1 %v1055_v33  ;;  %1172 = vmatprep.subr.mxu0 %v532_v34 }
  0x2c   : > { %1196 = vmatpush3.msra.mxu1 %v1055_v33  ;;  %1173 = vmatpush3.msra.mxu0 %v532_v34 }
  0x2d   : > { %1197 = vmatprep.subr.mxu1 %v1054_v35  ;;  %1174 = vmatprep.subr.mxu0 %v531_v36 }
  0x2e   : > { %1198 = vmatpush3.msra.mxu1 %v1054_v35  ;;  %1175 = vmatpush3.msra.mxu0 %v531_v36 }
  0x2f   : > { %1199 = vmatprep.subr.mxu1 %v1053_v37  ;;  %1176 = vmatprep.subr.mxu0 %v530_v38 }
  0x30   : > { %1200 = vmatpush3.msra.mxu1 %v1053_v37  ;;  %1177 = vmatpush3.msra.mxu0 %v530_v38 }
  0x31   : > { %1201 = vmatprep.subr.mxu1 %v1052_v39  ;;  %1178 = vmatprep.subr.mxu0 %v529_v40 }
  0x32   : > { %1202 = vmatpush3.msra.mxu1 %v1052_v39  ;;  %1179 = vmatpush3.msra.mxu0 %v529_v40  ;;  %v912_v39 = vsub.s32 %v909_v28, %v829_v0 }
  0x33   : > { %1203 = vmatprep.subr.mxu1 %v1051_v41  ;;  %1180 = vmatprep.subr.mxu0 %v528_v42 }
  0x34   : > { %1204 = vmatpush3.msra.mxu1 %v1051_v41  ;;  %1181 = vmatpush3.msra.mxu0 %v528_v42 }
  0x35   : > { %1205 = vmatprep.subr.mxu1 %v1050_v43  ;;  %1182 = vmatprep.subr.mxu0 %v527_v44 }
  0x36   : > { %1206 = vmatpush3.msra.mxu1 %v1050_v43  ;;  %1183 = vmatpush3.msra.mxu0 %v527_v44  ;;  %v1060_v44 = vld [vmem:[%s1469_s4] ss:$0 sm:$0xff] }
  0x37   : > { %1207 = vmatprep.subr.mxu1 %v1049_v45  ;;  %1184 = vmatprep.subr.mxu0 %v526_v46 }
  0x38   : > { %1208 = vmatpush3.msra.mxu1 %v1049_v45  ;;  %1185 = vmatpush3.msra.mxu0 %v526_v46 }
  0x39   : > { %1209 = vmatprep.subr.mxu1 %v1048_v47  ;;  %1186 = vmatprep.subr.mxu0 %v525_v48 }
  0x3a   : > { %1210 = vmatpush3.msra.mxu1 %v1048_v47  ;;  %1187 = vmatpush3.msra.mxu0 %v525_v48 }
  0x3b   : > { %1188 = vmatprep.mubr.msk.f32.mxu0 %vm277_vm3, %v523_v49  ;;  %1211 = vmatprep.subr.mxu1 %v1047_v50 }
  0x3c   : > { %1189 = vmatmul.mubr.msk.f32.vlgmr.msra.gmra.mxu0 %vm277_vm3, %v524_v51  ;;  %1212 = vmatpush3.msra.mxu1 %v1047_v50 }
  0x3d   : > { %1213 = vmatprep.subr.mxu1 %v1046_v52  ;;  %1215 = vmatprep.mubr.msk.f32.mxu1 %vm277_vm3, %v714_v53 }
  0x3e   : > { %1214 = vmatpush3.msra.mxu1 %v1046_v52 }
  0x3f   : > { %1216 = vmatmul.mubr.msk.f32.vlgmr.msra.gmra.mxu1 %vm277_vm3, %v715_v54 }
  0xd9   : > { %v359_v55 = vpop.f32.mrf.mxu0 }
  0xdb   : > { %v1122_v56 = vpop.f32.mrf.mxu0 }
  0xde   : > { %v432_v57 = vpop.f32.mrf.mxu0 }
  0xdf   : > { %v433_v62 = vadd.f32 %v432_v57, %v359_v55 }
  0xe0   : > { %v1129_v61 = vpop.f32.mrf.mxu0 }
  0xe3   : > { %v509_v1 = vpop.f32.mrf.mxu0 }
  0xe4   : > { %v513_v3 = vadd.f32 %v509_v1, %v433_v62 }
  0xe5   : > { %v1136_v4 = vpop.f32.mrf.mxu0 }
  0xe6   : > { %v521_v5 = vadd.f32 %v1029_v2, %v513_v3  ;;  %v1163_v25 = vpop.f32.mrf.mxu1 }
  0xe8   : > { %v522_v7 = vmax.f32 %v521_v5, 0.0  ;;  %v624_v35 = vpop.f32.mrf.mxu1 }
  0xea   : > { %v824_v8 = vcombine.high %v522_v7, %v522_v7  ;;  %v831_v9 = vrot.slane %v522_v7, %v830_v6 }
  0xec   : > { %v838_v10 = vrot.slane %v824_v8, %v830_v6  ;;  %v839_v11 = vcombine.high %v831_v9, %v831_v9  ;;  %v847_v16 = vrot.slane %v831_v9, %v830_v6 }
  0xee   : > { %v840_v12 = vcombine.high %v838_v10, %v838_v10  ;;  %v854_v14 = vrot.slane %v838_v10, %v830_v6  ;;  %v861_v15 = vrot.slane %v839_v11, %v830_v6  ;;  %v869_v23 = vcombine.high %v847_v16, %v847_v16 }
  0xef   : > { %v876_v37 = vrot.slane %v847_v16, %v875_v20 }
  0xf0   : > { %v868_v13 = vrot.slane %v840_v12, %v830_v6  ;;  %v870_v18 = vcombine.high %v854_v14, %v854_v14  ;;  %v871_v19 = vcombine.high %v861_v15, %v861_v15  ;;  %v880_v30 = vrot.slane %v861_v15, %v875_v20 }
  0xf1   : > { %v884_v31 = vrot.slane %v869_v23, %v875_v20  ;;  %v892_v32 = vrot.slane %v854_v14, %v875_v20 }
  0xf2   : > { %v872_v17 = vcombine.high %v868_v13, %v868_v13  ;;  %v896_v26 = vrot.slane %v868_v13, %v875_v20  ;;  %v900_v27 = vrot.slane %v870_v18, %v875_v20  ;;  %v888_v29 = vrot.slane %v871_v19, %v875_v20 }
  0xf3   : > { %v905_v47 = vcombine.low %v876_v37, %v880_v30 }
  0xf4   : > { %v904_v24 = vrot.slane %v872_v17, %v875_v20  ;;  %v922_v40 = vcombine.low %v892_v32, %v896_v26  ;;  %v906_v41 = vcombine.low %v884_v31, %v888_v29 }
  0xf5   : > { %v913_v56 = vrot.slane %v905_v47, %v912_v39 }
  0xf6   : > { %v923_v34 = vcombine.low %v900_v27, %v904_v24  ;;  %v930_v50 = vrot.slane %v922_v40, %v912_v39  ;;  %v920_v52 = vrot.slane %v906_v41, %v912_v39 }
  0xf8   : > { %v937_v46 = vrot.slane %v923_v34, %v912_v39  ;;  %v921_v59 = vcombine.low %v913_v56, %v920_v52 }
  0xfa   : > { %v938_v54 = vcombine.low %v930_v50, %v937_v46 }
  0xfc   : > { %v1190_v33 = vpop.f32.mrf.mxu0 }
  0xfd   : > { %v711_v36 = vadd.f32 %v1190_v33, %v1163_v25 }
  0xfe   : > { %v705_v38 = vpop.f32.mrf.mxu0 }
  0xff   : > { %v706_v42 = vadd.f32 %v705_v38, %v624_v35  ;;  %v1217_v43 = vpop.f32.mrf.mxu1 }
 0x100   : > { %v811_v45 = vadd.f32 %v1217_v43, %v711_v36 }
 0x101   : > { %v801_v48 = vpop.f32.mrf.mxu1 }
 0x102   : > { %v820_v49 = vadd.f32 %v1060_v44, %v811_v45  ;;  %v810_v51 = vadd.f32 %v801_v48, %v706_v42 }
 0x104   : > { %v822_v53 = vmax.f32 %v820_v49, 0.0  ;;  %v819_v55 = vadd.f32 %v1060_v44, %v810_v51 }
 0x106   : > { %v942_v57 = vadd.f32 %v938_v54, %v822_v53  ;;  %v821_v58 = vmax.f32 %v819_v55, 0.0 }
 0x108   : > { %944 = vst [vmem:[%s268_s13 + $0x8] sm:$0xff] %v942_v57  ;;  %v941_v60 = vadd.f32 %v921_v59, %v821_v58 }
 0x10a   : > { %943 = vst [vmem:[%s268_s13] sm:$0xff] %v941_v60 }
 0x10b PF: > { %s16_s21 = sadd.s32 1, %s1236_s21  }
 0x10c   : > { %p13_p4 = scmp.ge.s32.totalorder %s16_s21, 4  }
 0x10e   :  { %15 = sbr.rel (!%p13_p4) target bundleno = 1 (0x1), region = 81 }

</bundles_post_ra>
